<compile_context>
chip_gen: v7x
topology: tpu7x:2x2x1
jax: 0.10.0
libtpu: 0.0.40
codegen_flags: <defaults>
</compile_context>

<pallas_src>
import numpy as np
import jax
import jax.numpy as jnp
from jax.experimental import pallas as pl
from jax.experimental.pallas import tpu as pltpu


def _round_up(n, m):
    return ((n + m - 1) // m) * m


def fm_search_kernel(ids_ref, embT_ref, sqT_ref, w_ref, prob_ref, bias_ref, out_ref):
    # ids_ref : (F, TB)  int32 VMEM  - feature ids, batch on the lane axis (streamed)
    # embT_ref: (D, V)   f32   VMEM  - transposed embedding table (resident)
    # sqT_ref : (D, V)   f32   VMEM  - elementwise square of embT (resident)
    # w_ref   : (V, 1)   f32   VMEM  - FeaturesLinear per-feature weights (resident)
    # prob_ref: (F,)     f32   SMEM  - softmax(arch / beta)
    # bias_ref: (1,)     f32   SMEM  - FeaturesLinear bias
    # out_ref : (1, TB)  f32   VMEM  - lane-dense output slab
    F, TB = ids_ref.shape
    D, V = embT_ref.shape

    row_v = jax.lax.broadcasted_iota(jnp.int32, (V, TB), 0)

    # Accumulate prob-scaled one-hots over fields.  Temporaries are bounded to a
    # few (V, TB) vregs; no (F, D, TB)-sized tensor is ever formed.
    a_p = jnp.zeros((V, TB), jnp.float32)    # sum_f p_f   * onehot(x[:, f])
    a_p2 = jnp.zeros((V, TB), jnp.float32)   # sum_f p_f^2 * onehot(x[:, f])
    a_1 = jnp.zeros((V, TB), jnp.float32)    # sum_f         onehot(x[:, f])
    for f in range(F):                       # F is small & static -> unrolled
        ids_f = ids_ref[pl.ds(f, 1), :]      # (1, TB) int32
        match = row_v == ids_f               # (V, TB) bool
        p_f = prob_ref[f]                    # SMEM scalar
        a_p = a_p + jnp.where(match, p_f, 0.0)
        a_p2 = a_p2 + jnp.where(match, p_f * p_f, 0.0)
        a_1 = a_1 + jnp.where(match, 1.0, 0.0)

    # Fused gather + field reduction on the MXU:
    #   s[d, b]  = sum_f p_f   * emb[x[b, f], d]
    #   sq[d, b] = sum_f p_f^2 * emb[x[b, f], d]^2
    s = jnp.dot(embT_ref[...], a_p,
                precision=jax.lax.Precision.HIGHEST,
                preferred_element_type=jnp.float32)              # (D, TB)
    sq = jnp.dot(sqT_ref[...], a_p2,
                 precision=jax.lax.Precision.HIGHEST,
                 preferred_element_type=jnp.float32)             # (D, TB)

    # FactorizationMachine(reduce_sum=True): small sublane reduce over D.
    fm = 0.5 * jnp.sum(s * s - sq, axis=0, keepdims=True)        # (1, TB)
    # FeaturesLinear: sum over fields + bias (VPU multiply + sublane reduce).
    lin = jnp.sum(w_ref[...] * a_1, axis=0, keepdims=True) + bias_ref[0]
    out_ref[...] = lin + fm


def _tpu_hints():
    """Return (two_tensorcores, vmem_limit_bytes) for the current backend."""
    kind = ""
    try:
        kind = jax.devices()[0].device_kind.lower()
    except Exception:
        pass
    # 2 TensorCores share the 'parallel' grid axis on megacore (v4/v5p) and v7x.
    two_tc = any(t in kind for t in ("v7", "7x", "v4", "v5p"))
    vmem_cap = None
    try:
        vmem_cap = int(pltpu.get_tpu_info().vmem_capacity_bytes)
    except Exception:
        pass
    if vmem_cap is None:
        vmem_cap = (64 << 20) if two_tc else (128 << 20)
    # 64 MiB-class budget on v5e/v6e (128 MiB physical), ~48 MiB on v7x (64 MiB/TC).
    vmem_limit = int(min(64 << 20, (vmem_cap * 3) // 4))
    return two_tc, vmem_limit


def _pick_tb(B, F, D, V, two_tc, vmem_limit, cap=8192):
    """Lane-aligned batch tile: one big tile on single-TC chips, an even number
    of grid steps on 2-TC chips, capped by a conservative per-lane VMEM estimate
    (double-buffered streamed blocks + in-kernel temporaries)."""
    per_lane = 4 * (2 * F + 2 + 6 * V + 4 * D) + 64
    max_tb = max(128, min(cap, ((vmem_limit // 2) // per_lane) // 128 * 128))
    tb = min(max_tb, _round_up(B, 128))
    if two_tc and B > 128:
        steps = -(-_round_up(B, 128) // tb)
        if steps % 2 == 1:
            steps += 1
            tb = min(max_tb, max(128, _round_up(-(-B // steps), 128)))
    return int(tb)


def fm_search_forward(x, embedding, lin_w, lin_bias, arch, beta=1.0, tb=None):
    """x: (B, F) int32 global feature ids.  Returns (B,) scores."""
    B, F = x.shape
    V, D = embedding.shape

    # arch softmax: tiny (F,) vector, computed once outside the kernel.
    prob = jax.nn.softmax(arch.astype(jnp.float32) / beta, axis=0)        # (F,)
    bias = lin_bias.reshape(1).astype(jnp.float32)                        # (1,)

    # Tiny VMEM-resident tables (feature_num x latent_dim).  The squared table
    # is precomputed here (O(V*D), negligible) so the kernel never forms xv^2.
    # TODO(synk): for very large feature_num (table no longer VMEM-resident /
    # one-hot too wide), fall back to a manual double-buffered per-row DMA
    # gather with the table left in HBM (memory_space=pl.ANY).
    embT = jnp.transpose(embedding.astype(jnp.float32), (1, 0))           # (D, V)
    sqT = embT * embT                                                     # (D, V)
    w_col = lin_w.reshape(V, 1).astype(jnp.float32)                       # (V, 1)

    # Only the id matrix is streamed per block, with batch on the lane axis.
    ids = jnp.transpose(x.astype(jnp.int32), (1, 0))                      # (F, B)

    two_tc, vmem_limit = _tpu_hints()
    if tb is None:
        tb = _pick_tb(B, F, D, V, two_tc, vmem_limit)
    Bp = _round_up(B, tb)
    if Bp != B:
        ids = jnp.pad(ids, ((0, 0), (0, Bp - B)))   # pad with id 0 (valid row); sliced off below

    out = pl.pallas_call(
        fm_search_kernel,
        out_shape=jax.ShapeDtypeStruct((1, Bp), jnp.float32),
        grid=(Bp // tb,),
        in_specs=[
            pl.BlockSpec((F, tb), lambda i: (0, i)),             # streamed ids
            pl.BlockSpec((D, V), lambda i: (0, 0)),              # resident embT
            pl.BlockSpec((D, V), lambda i: (0, 0)),              # resident embT^2
            pl.BlockSpec((V, 1), lambda i: (0, 0)),              # resident lin_w
            pl.BlockSpec(memory_space=pltpu.MemorySpace.SMEM),   # prob (F,)
            pl.BlockSpec(memory_space=pltpu.MemorySpace.SMEM),   # bias (1,)
        ],
        out_specs=pl.BlockSpec((1, tb), lambda i: (0, i)),
        compiler_params=pltpu.CompilerParams(
            dimension_semantics=("parallel",),
            vmem_limit_bytes=vmem_limit,
        ),
    )(ids, embT, sqT, w_col, prob, bias)
    return out.reshape(Bp)[:B]                                            # (B,)


def fm_search_reference(x, embedding, lin_w, lin_bias, arch, beta=1.0):
    """Pure-JAX reference mirroring the PyTorch module."""
    prob = jax.nn.softmax(arch / beta, axis=0)                # (F,)
    xv = embedding[x]                                         # (B, F, D)
    xe = xv * prob[None, :, None]
    sos = jnp.sum(xe, axis=1) ** 2
    sosq = jnp.sum(xe ** 2, axis=1)
    fm = 0.5 * jnp.sum(sos - sosq, axis=1, keepdims=True)     # (B, 1)
    lin = jnp.sum(lin_w[x], axis=1) + lin_bias                # (B, 1)
    return (lin + fm)[:, 0]


if __name__ == "__main__":
    # small config consistent with the module
    field_dim = [3, 4, 5, 4]                 # opt['field_dim']
    latent_dim = 16                          # opt['latent_dim']
    field_num = len(field_dim)               # F = 4
    feature_num = sum(field_dim)             # V = 16
    B = 512

    key = jax.random.PRNGKey(0)
    k_emb, k_lin, k_arch, k_x = jax.random.split(key, 4)

    # xavier-uniform embedding (feature_num, latent_dim)
    bound = float(np.sqrt(6.0 / (feature_num + latent_dim)))
    embedding = jax.random.uniform(
        k_emb, (feature_num, latent_dim), jnp.float32, -bound, bound)

    # FeaturesLinear: per-feature weight (feature_num, 1) + zero bias
    lin_w = jax.random.normal(k_lin, (feature_num, 1), jnp.float32) * 0.1
    lin_bias = jnp.zeros((1,), jnp.float32)

    # architecture logits, one per field
    arch = jax.random.normal(k_arch, (field_num,), jnp.float32)

    # input: (B, F) global feature ids, each column indexing within its field
    offsets = np.concatenate([[0], np.cumsum(field_dim)[:-1]]).astype(np.int32)
    ks = jax.random.split(k_x, field_num)
    cols = [jax.random.randint(ks[f], (B,), 0, field_dim[f]) + int(offsets[f])
            for f in range(field_num)]
    x = jnp.stack(cols, axis=1).astype(jnp.int32)             # (B, F)

    beta = 1.0
    score = fm_search_forward(x, embedding, lin_w, lin_bias, arch, beta=beta)
    score = jax.block_until_ready(score)

    ref = fm_search_reference(x, embedding, lin_w, lin_bias, arch, beta=beta)
    np.testing.assert_allclose(np.asarray(score), np.asarray(ref),
                               rtol=1e-4, atol=1e-4)
    print("KERNEL_OK")
</pallas_src>

<mosaic_0001>
module attributes {stable_mosaic.version = 11 : i64} {
  func.func @fm_search_kernel(%arg0: i32, %arg1: memref<4x512xi32, #tpu.memory_space<vmem>>, %arg2: memref<16x16xf32, #tpu.memory_space<vmem>>, %arg3: memref<16x16xf32, #tpu.memory_space<vmem>>, %arg4: memref<16x1xf32, #tpu.memory_space<vmem>>, %arg5: memref<4xf32, #tpu.memory_space<smem>>, %arg6: memref<1xf32, #tpu.memory_space<smem>>, %arg7: memref<1x512xf32, #tpu.memory_space<vmem>>) attributes {dimension_semantics = [#tpu.dimension_semantics<parallel>], iteration_bounds = array<i64: 1>, scalar_prefetch = 0 : i64, scratch_operands = 0 : i64, tpu.core_type = #tpu.core_type<tc>, window_params = [{transform_indices = @transform_0, window_bounds = array<i64: 4, 512>}, {pipeline_mode = #tpu.pipeline_mode<synchronous>, transform_indices = @transform_1, window_bounds = array<i64: 16, 16>}, {pipeline_mode = #tpu.pipeline_mode<synchronous>, transform_indices = @transform_2, window_bounds = array<i64: 16, 16>}, {pipeline_mode = #tpu.pipeline_mode<synchronous>, transform_indices = @transform_3, window_bounds = array<i64: 16, 1>}, {transform_indices = @transform_4, window_bounds = array<i64: 4>}, {transform_indices = @transform_5, window_bounds = array<i64: 1>}, {transform_indices = @transform_6, window_bounds = array<i64: 1, 512>}]} {
    %0 = tpu.iota {dimensions = array<i32: 0>} : vector<16x512xi32>
    %cst = arith.constant 0.000000e+00 : f32
    %1 = vector.broadcast %cst : f32 to vector<16x512xf32>
    %cst_0 = arith.constant 0.000000e+00 : f32
    %2 = vector.broadcast %cst_0 : f32 to vector<16x512xf32>
    %cst_1 = arith.constant 0.000000e+00 : f32
    %3 = vector.broadcast %cst_1 : f32 to vector<16x512xf32>
    %c0 = arith.constant 0 : index
    %c0_2 = arith.constant 0 : index
    %4 = vector.load %arg1[%c0, %c0_2] : memref<4x512xi32, #tpu.memory_space<vmem>>, vector<1x512xi32>
    %5 = vector.broadcast %4 : vector<1x512xi32> to vector<16x512xi32>
    %6 = arith.cmpi eq, %0, %5 : vector<16x512xi32>
    %c0_3 = arith.constant 0 : index
    %7 = memref.load %arg5[%c0_3] : memref<4xf32, #tpu.memory_space<smem>>
    %cst_4 = arith.constant 0.000000e+00 : f32
    %8 = vector.broadcast %7 : f32 to vector<16x512xf32>
    %9 = vector.broadcast %cst_4 : f32 to vector<16x512xf32>
    %10 = arith.select %6, %8, %9 : vector<16x512xi1>, vector<16x512xf32>
    %11 = arith.addf %1, %10 : vector<16x512xf32>
    %12 = arith.mulf %7, %7 : f32
    %cst_5 = arith.constant 0.000000e+00 : f32
    %13 = vector.broadcast %12 : f32 to vector<16x512xf32>
    %14 = vector.broadcast %cst_5 : f32 to vector<16x512xf32>
    %15 = arith.select %6, %13, %14 : vector<16x512xi1>, vector<16x512xf32>
    %16 = arith.addf %2, %15 : vector<16x512xf32>
    %cst_6 = arith.constant 1.000000e+00 : f32
    %cst_7 = arith.constant 0.000000e+00 : f32
    %17 = vector.broadcast %cst_6 : f32 to vector<16x512xf32>
    %18 = vector.broadcast %cst_7 : f32 to vector<16x512xf32>
    %19 = arith.select %6, %17, %18 : vector<16x512xi1>, vector<16x512xf32>
    %20 = arith.addf %3, %19 : vector<16x512xf32>
    %c1 = arith.constant 1 : index
    %c0_8 = arith.constant 0 : index
    %21 = vector.load %arg1[%c1, %c0_8] : memref<4x512xi32, #tpu.memory_space<vmem>>, vector<1x512xi32>
    %22 = vector.broadcast %21 : vector<1x512xi32> to vector<16x512xi32>
    %23 = arith.cmpi eq, %0, %22 : vector<16x512xi32>
    %c1_9 = arith.constant 1 : index
    %24 = memref.load %arg5[%c1_9] : memref<4xf32, #tpu.memory_space<smem>>
    %cst_10 = arith.constant 0.000000e+00 : f32
    %25 = vector.broadcast %24 : f32 to vector<16x512xf32>
    %26 = vector.broadcast %cst_10 : f32 to vector<16x512xf32>
    %27 = arith.select %23, %25, %26 : vector<16x512xi1>, vector<16x512xf32>
    %28 = arith.addf %11, %27 : vector<16x512xf32>
    %29 = arith.mulf %24, %24 : f32
    %cst_11 = arith.constant 0.000000e+00 : f32
    %30 = vector.broadcast %29 : f32 to vector<16x512xf32>
    %31 = vector.broadcast %cst_11 : f32 to vector<16x512xf32>
    %32 = arith.select %23, %30, %31 : vector<16x512xi1>, vector<16x512xf32>
    %33 = arith.addf %16, %32 : vector<16x512xf32>
    %cst_12 = arith.constant 1.000000e+00 : f32
    %cst_13 = arith.constant 0.000000e+00 : f32
    %34 = vector.broadcast %cst_12 : f32 to vector<16x512xf32>
    %35 = vector.broadcast %cst_13 : f32 to vector<16x512xf32>
    %36 = arith.select %23, %34, %35 : vector<16x512xi1>, vector<16x512xf32>
    %37 = arith.addf %20, %36 : vector<16x512xf32>
    %c2 = arith.constant 2 : index
    %c0_14 = arith.constant 0 : index
    %38 = vector.load %arg1[%c2, %c0_14] : memref<4x512xi32, #tpu.memory_space<vmem>>, vector<1x512xi32>
    %39 = vector.broadcast %38 : vector<1x512xi32> to vector<16x512xi32>
    %40 = arith.cmpi eq, %0, %39 : vector<16x512xi32>
    %c2_15 = arith.constant 2 : index
    %41 = memref.load %arg5[%c2_15] : memref<4xf32, #tpu.memory_space<smem>>
    %cst_16 = arith.constant 0.000000e+00 : f32
    %42 = vector.broadcast %41 : f32 to vector<16x512xf32>
    %43 = vector.broadcast %cst_16 : f32 to vector<16x512xf32>
    %44 = arith.select %40, %42, %43 : vector<16x512xi1>, vector<16x512xf32>
    %45 = arith.addf %28, %44 : vector<16x512xf32>
    %46 = arith.mulf %41, %41 : f32
    %cst_17 = arith.constant 0.000000e+00 : f32
    %47 = vector.broadcast %46 : f32 to vector<16x512xf32>
    %48 = vector.broadcast %cst_17 : f32 to vector<16x512xf32>
    %49 = arith.select %40, %47, %48 : vector<16x512xi1>, vector<16x512xf32>
    %50 = arith.addf %33, %49 : vector<16x512xf32>
    %cst_18 = arith.constant 1.000000e+00 : f32
    %cst_19 = arith.constant 0.000000e+00 : f32
    %51 = vector.broadcast %cst_18 : f32 to vector<16x512xf32>
    %52 = vector.broadcast %cst_19 : f32 to vector<16x512xf32>
    %53 = arith.select %40, %51, %52 : vector<16x512xi1>, vector<16x512xf32>
    %54 = arith.addf %37, %53 : vector<16x512xf32>
    %c3 = arith.constant 3 : index
    %c0_20 = arith.constant 0 : index
    %55 = vector.load %arg1[%c3, %c0_20] : memref<4x512xi32, #tpu.memory_space<vmem>>, vector<1x512xi32>
    %56 = vector.broadcast %55 : vector<1x512xi32> to vector<16x512xi32>
    %57 = arith.cmpi eq, %0, %56 : vector<16x512xi32>
    %c3_21 = arith.constant 3 : index
    %58 = memref.load %arg5[%c3_21] : memref<4xf32, #tpu.memory_space<smem>>
    %cst_22 = arith.constant 0.000000e+00 : f32
    %59 = vector.broadcast %58 : f32 to vector<16x512xf32>
    %60 = vector.broadcast %cst_22 : f32 to vector<16x512xf32>
    %61 = arith.select %57, %59, %60 : vector<16x512xi1>, vector<16x512xf32>
    %62 = arith.addf %45, %61 : vector<16x512xf32>
    %63 = arith.mulf %58, %58 : f32
    %cst_23 = arith.constant 0.000000e+00 : f32
    %64 = vector.broadcast %63 : f32 to vector<16x512xf32>
    %65 = vector.broadcast %cst_23 : f32 to vector<16x512xf32>
    %66 = arith.select %57, %64, %65 : vector<16x512xi1>, vector<16x512xf32>
    %67 = arith.addf %50, %66 : vector<16x512xf32>
    %cst_24 = arith.constant 1.000000e+00 : f32
    %cst_25 = arith.constant 0.000000e+00 : f32
    %68 = vector.broadcast %cst_24 : f32 to vector<16x512xf32>
    %69 = vector.broadcast %cst_25 : f32 to vector<16x512xf32>
    %70 = arith.select %57, %68, %69 : vector<16x512xi1>, vector<16x512xf32>
    %71 = arith.addf %54, %70 : vector<16x512xf32>
    %c0_26 = arith.constant 0 : index
    %c0_27 = arith.constant 0 : index
    %72 = vector.load %arg2[%c0_26, %c0_27] : memref<16x16xf32, #tpu.memory_space<vmem>>, vector<16x16xf32>
    %cst_28 = arith.constant dense<0.000000e+00> : vector<16x512xf32>
    %73 = tpu.matmul %72, %62, %cst_28 {dimension_numbers = #tpu.dot_dimension_numbers<[1], [0], [0], [1], [0, 0, 1, 1], [], []>, precision = #tpu.contract_precision<fp32>} : vector<16x16xf32>, vector<16x512xf32>, vector<16x512xf32> -> vector<16x512xf32>
    %c0_29 = arith.constant 0 : index
    %c0_30 = arith.constant 0 : index
    %74 = vector.load %arg3[%c0_29, %c0_30] : memref<16x16xf32, #tpu.memory_space<vmem>>, vector<16x16xf32>
    %cst_31 = arith.constant dense<0.000000e+00> : vector<16x512xf32>
    %75 = tpu.matmul %74, %67, %cst_31 {dimension_numbers = #tpu.dot_dimension_numbers<[1], [0], [0], [1], [0, 0, 1, 1], [], []>, precision = #tpu.contract_precision<fp32>} : vector<16x16xf32>, vector<16x512xf32>, vector<16x512xf32> -> vector<16x512xf32>
    %76 = arith.mulf %73, %73 : vector<16x512xf32>
    %77 = arith.subf %76, %75 : vector<16x512xf32>
    %cst_32 = arith.constant dense<0.000000e+00> : vector<512xf32>
    %78 = vector.multi_reduction <add>, %77, %cst_32 [0] : vector<16x512xf32> to vector<512xf32>
    %79 = vector.shape_cast %78 : vector<512xf32> to vector<1x512xf32>
    %cst_33 = arith.constant 5.000000e-01 : f32
    %80 = vector.broadcast %cst_33 : f32 to vector<1x512xf32>
    %81 = arith.mulf %80, %79 : vector<1x512xf32>
    %c0_34 = arith.constant 0 : index
    %c0_35 = arith.constant 0 : index
    %82 = vector.load %arg4[%c0_34, %c0_35] : memref<16x1xf32, #tpu.memory_space<vmem>>, vector<16x1xf32>
    %83 = vector.broadcast %82 : vector<16x1xf32> to vector<16x512xf32>
    %84 = arith.mulf %83, %71 : vector<16x512xf32>
    %cst_36 = arith.constant dense<0.000000e+00> : vector<512xf32>
    %85 = vector.multi_reduction <add>, %84, %cst_36 [0] : vector<16x512xf32> to vector<512xf32>
    %86 = vector.shape_cast %85 : vector<512xf32> to vector<1x512xf32>
    %c0_37 = arith.constant 0 : index
    %87 = memref.load %arg6[%c0_37] : memref<1xf32, #tpu.memory_space<smem>>
    %88 = vector.broadcast %87 : f32 to vector<1x512xf32>
    %89 = arith.addf %86, %88 : vector<1x512xf32>
    %90 = arith.addf %89, %81 : vector<1x512xf32>
    %c0_38 = arith.constant 0 : index
    %c0_39 = arith.constant 0 : index
    %91 = vector.load %arg7[%c0_38, %c0_39] : memref<1x512xf32, #tpu.memory_space<vmem>>, vector<1x512xf32>
    tpu.vector_store %arg7[%c0_38, %c0_39], %90 {strides = array<i32>} : memref<1x512xf32, #tpu.memory_space<vmem>>, vector<1x512xf32>,
    return
  }
  func.func @transform_0(%arg0: i32) -> (i32, i32) {
    %c0_i32 = arith.constant 0 : i32
    %c0_i32_0 = arith.constant 0 : i32
    return %c0_i32, %arg0 : i32, i32
  }
  func.func @transform_1(%arg0: i32) -> (i32, i32) {
    %c0_i32 = arith.constant 0 : i32
    %c0_i32_0 = arith.constant 0 : i32
    %c0_i32_1 = arith.constant 0 : i32
    return %c0_i32, %c0_i32_0 : i32, i32
  }
  func.func @transform_2(%arg0: i32) -> (i32, i32) {
    %c0_i32 = arith.constant 0 : i32
    %c0_i32_0 = arith.constant 0 : i32
    %c0_i32_1 = arith.constant 0 : i32
    return %c0_i32, %c0_i32_0 : i32, i32
  }
  func.func @transform_3(%arg0: i32) -> (i32, i32) {
    %c0_i32 = arith.constant 0 : i32
    %c0_i32_0 = arith.constant 0 : i32
    %c0_i32_1 = arith.constant 0 : i32
    return %c0_i32, %c0_i32_0 : i32, i32
  }
  func.func @transform_4(%arg0: i32) -> i32 {
    %c0_i32 = arith.constant 0 : i32
    %c0_i32_0 = arith.constant 0 : i32
    return %c0_i32 : i32
  }
  func.func @transform_5(%arg0: i32) -> i32 {
    %c0_i32 = arith.constant 0 : i32
    %c0_i32_0 = arith.constant 0 : i32
    return %c0_i32 : i32
  }
  func.func @transform_6(%arg0: i32) -> (i32, i32) {
    %c0_i32 = arith.constant 0 : i32
    %c0_i32_0 = arith.constant 0 : i32
    return %c0_i32, %arg0 : i32, i32
  }
}

</mosaic_0001>

<bundles_post_ra>
// kernel: tpu_custom_call.1
= control target key start
LH: loop header
LB: loop body
LE: loop exit
PB: predicated region body
PF: predicated region fallthrough
CT: control target
= control target key end

     0   :  { %12 = vsyncpa [#allocation4], 0  ;;  %s4084_s0 = inlined_call_operand.hbm [shape: s32[4,512], index: 0, kind: input, shape index: {}]   ;;  %s4085_s1 = inlined_call_operand.hbm [shape: f32[16,16], index: 1, kind: input, shape index: {}]   ;;  %s4086_s2 = inlined_call_operand.hbm [shape: f32[16,16], index: 2, kind: input, shape index: {}]   ;;  %s4087_s3 = inlined_call_operand.hbm [shape: f32[16,1], index: 3, kind: input, shape index: {}]   ;;  %s4088_s4 = inlined_call_operand.hbm [shape: f32[4], index: 4, kind: input, shape index: {}]   ;;  %s4089_s5 = inlined_call_operand.<no memory space> [shape: f32[1], index: 5, kind: input, shape index: {}]   ;;  %s4090_s6 = inlined_call_operand.hbm [shape: f32[1,512], index: 6, kind: output, shape index: {}]  }
   0x1   :  { %13 = vsyncpa [#allocation8], 0 }
   0x2   :  { %14 = vsyncpa [#allocation11], 0 }
   0x3   :  { %15 = vsyncpa [#allocation6], 0 }
   0x4   :  { %16 = vsyncpa [#allocation5], 0  ;;  %s3059_s21 = smov [#allocation7]   ;;  %s2929_s25 = scalar_lea.hbm %s4085_s1, 256 }
   0x5   :  { %s32_s22 = sshll.u32 %s3059_s21, 4  ;;  %p2930_p0 = scmp.ne.s32.totalorder %s4085_s1, %s2929_s25  ;;  %s33_s22 = int_to_ptr.vmem [resolvable:$true] %s32_s22 }
   0x6   :  { %p2933_p1 = scmp.lt.u32.totalorder %s2929_s25, %s4085_s1 }
   0x8   :  { %p2935_p2 = pnand %p2933_p1, %p2930_p0 }
   0xa   :  { %2938 = shalt.err (!%p2935_p2)
}
   0xb   :  { %s2939_s30 = scalar_lea.vmem %s33_s22, 256  ;;  %p2944_p4 = scmp.lt.s32.totalorder %s33_s22, %s33_s22 }
   0xc   :  { %p2940_p3 = scmp.ne.s32.totalorder %s33_s22, %s2939_s30  ;;  %p2945_p5 = scmp.lt.s32.totalorder %s2939_s30, %s2939_s30 }
   0xe   :  { %p2946_p6 = por %p2945_p5, %p2944_p4 }
  0x10   :  { %p2947_p7 = pnand %p2946_p6, %p2940_p3 }
  0x12   :  { %2950 = shalt.err (!%p2947_p7)
}
  0x13   :  { %s3060_s7 = smov 128   ;;  %s3061_s8 = smov 8  }
  0x14   :  { %38 = dma.hbm_to_vmem [thread:$0]  %s4085_s1, 256, %s33_s22, [#allocation8], %s3060_s7, %s3060_s7, %s3061_s8  }
  0x15   :  { %s3062_s11 = smov [#allocation3]   ;;  %s3063_s13 = smov [#allocation9]  }
  0x16   :  { %s23_s12 = sshll.u32 %s3062_s11, 4  ;;  %s44_s14 = sshll.u32 %s3063_s13, 4  ;;  %s24_s12 = int_to_ptr.vmem [resolvable:$true] %s23_s12  ;;  %s45_s14 = int_to_ptr.vmem [resolvable:$true] %s44_s14 }
  0x17   :  { %s2951_s17 = scalar_lea.hbm %s4084_s0, 256 }
  0x18   :  { %p2952_p8 = scmp.ne.s32.totalorder %s4084_s0, %s2951_s17  ;;  %p2955_p9 = scmp.lt.u32.totalorder %s2951_s17, %s4084_s0 }
  0x1a   :  { %p2957_p10 = pnand %p2955_p9, %p2952_p8 }
  0x1c   :  { %2960 = shalt.err (!%p2957_p10)
}
  0x1d   :  { %s2961_s1 = scalar_lea.vmem %s24_s12, 256  ;;  %p2966_p12 = scmp.lt.s32.totalorder %s24_s12, %s24_s12 }
  0x1e   :  { %p2962_p11 = scmp.ne.s32.totalorder %s24_s12, %s2961_s1  ;;  %p2967_p13 = scmp.lt.s32.totalorder %s2961_s1, %s2961_s1 }
  0x20   :  { %p2968_p0 = por %p2967_p13, %p2966_p12 }
  0x22   :  { %p2969_p1 = pnand %p2968_p0, %p2962_p11 }
  0x24   :  { %2972 = shalt.err (!%p2969_p1)
}
  0x25   :  { %26 = dma.hbm_to_vmem [thread:$0]  %s4084_s0, 256, %s24_s12, [#allocation4]  }
  0x26   :  { %s2973_s26 = scalar_lea.hbm %s4086_s2, 256 }
  0x27   :  { %p2974_p2 = scmp.ne.s32.totalorder %s4086_s2, %s2973_s26  ;;  %p2977_p3 = scmp.lt.u32.totalorder %s2973_s26, %s4086_s2 }
  0x29   :  { %p2979_p4 = pnand %p2977_p3, %p2974_p2 }
  0x2b   :  { %2982 = shalt.err (!%p2979_p4)
}
  0x2c   :  { %s2983_s9 = scalar_lea.vmem %s45_s14, 256  ;;  %p2988_p6 = scmp.lt.s32.totalorder %s45_s14, %s45_s14 }
  0x2d   :  { %p2984_p5 = scmp.ne.s32.totalorder %s45_s14, %s2983_s9  ;;  %p2989_p7 = scmp.lt.s32.totalorder %s2983_s9, %s2983_s9 }
  0x2f   :  { %p2990_p8 = por %p2989_p7, %p2988_p6 }
  0x31   :  { %p2991_p9 = pnand %p2990_p8, %p2984_p5 }
  0x33   :  { %2994 = shalt.err (!%p2991_p9)
}
  0x34   :  { %50 = dma.hbm_to_vmem [thread:$0]  %s4086_s2, 256, %s45_s14, [#allocation8], %s3060_s7, %s3060_s7, %s3061_s8  }
  0x35   :  { %s3064_s11 = smov [#allocation10]   ;;  %s2995_s16 = scalar_lea.hbm %s4087_s3, 256 }
  0x36   :  { %s56_s12 = sshll.u32 %s3064_s11, 4  ;;  %p2996_p10 = scmp.ne.s32.totalorder %s4087_s3, %s2995_s16  ;;  %s57_s12 = int_to_ptr.vmem [resolvable:$true] %s56_s12 }
  0x37   :  { %p2999_p11 = scmp.lt.u32.totalorder %s2995_s16, %s4087_s3 }
  0x39   :  { %p3001_p12 = pnand %p2999_p11, %p2996_p10 }
  0x3b   :  { %3004 = shalt.err (!%p3001_p12)
}
  0x3c   :  { %s3005_s21 = scalar_lea.vmem %s57_s12, 256  ;;  %p3010_p0 = scmp.lt.s32.totalorder %s57_s12, %s57_s12 }
  0x3d   :  { %p3006_p13 = scmp.ne.s32.totalorder %s57_s12, %s3005_s21  ;;  %p3011_p1 = scmp.lt.s32.totalorder %s3005_s21, %s3005_s21 }
  0x3f   :  { %p3012_p2 = por %p3011_p1, %p3010_p0 }
  0x41   :  { %p3013_p3 = pnand %p3012_p2, %p3006_p13 }
  0x43   :  { %3016 = shalt.err (!%p3013_p3)
}
  0x44   :  { %62 = dma.hbm_to_vmem [thread:$0]  %s4087_s3, 256, %s57_s12, [#allocation11], %s3060_s7, %s3060_s7, %s3061_s8  }
  0x45   :  { %s3017_s23 = scalar_lea.hbm %s4088_s4, 16 }
  0x46   :  { %p3018_p4 = scmp.ne.s32.totalorder %s4088_s4, %s3017_s23  ;;  %p3021_p5 = scmp.lt.u32.totalorder %s3017_s23, %s4088_s4 }
  0x48   :  { %p3023_p6 = pnand %p3021_p5, %p3018_p4 }
  0x4a   :  { %3026 = shalt.err (!%p3023_p6)
}
  0x4b   :  { %s3065_s28 = smov [#allocation12]  }
  0x4c   :  { %70 = dma.hbm_to_smem %s4088_s4, 16, %s3065_s28, [#allocation6]  }
  0x4d   :  { %3049 = dma.done.wait [#allocation4], 256  }
  0x4e   :  { %3050 = vsyncadd [#allocation4], 4294967040 }
  0x4f   :  { %3051 = dma.done.wait [#allocation8], 512  }
  0x50   :  { %3052 = vsyncadd [#allocation8], 4294966784 }
  0x51   :  { %3053 = dma.done.wait [#allocation11], 256  }
  0x52   :  { %3054 = vsyncadd [#allocation11], 4294967040 }
  0x53   :  { %3055 = dma.done.wait [#allocation6], 16  }
  0x54   :  { %3056 = vsyncadd [#allocation6], 4294967280 }
  0x55   :  { %88 = sfence }
  0x56   :  { %v4108_v0 = vlaneseq  ;;  %s3174_s3 = sld [smem:[#allocation12]]  ;;  %v3176_v1 = vld [vmem:[#allocation3] ss:$4 sm:$0xf]  ;;  %s3180_s7 = sld [smem:[#allocation12 + $0x1]]  ;;  %v3066_v3 = vmov 0.0  }
  0x57   :  { %v3178_v2 = vld [vmem:[#allocation3 + $0x1] ss:$4 sm:$0xf]  ;;  %480 = vmatprep.mubr.f32.mxu0 %v3066_v3  ;;  %1020 = vmatprep.mubr.f32.mxu1 %v3066_v3  ;;  %v403_v4 = vld [vmem:[#allocation7] sm:$0xff]  ;;  %s3189_s4 = sld [smem:[#allocation12 + $0x2]]  ;;  %s3193_s8 = sld [smem:[#allocation12 + $0x3]] }
  0x58   :  { %v3185_v5 = vshrl.u32 %v4108_v0, 7  ;;  %v3187_v6 = vld [vmem:[#allocation3 + $0x2] ss:$4 sm:$0xf]  ;;  %vm4091_vm0 = vcmask 130048   ;;  %v404_v11 = vld [vmem:[#allocation7 + $0x8] sm:$0xff] }
  0x59   :  { %v3191_v7 = vld [vmem:[#allocation3 + $0x3] ss:$4 sm:$0xf]  ;;  %v3207_v14 = vsel %vm4091_vm0, %v403_v4, 0  ;;  %v3210_v15 = vsel %vm4091_vm0, %v404_v11, 0 }
  0x5a   :  { %v3196_v8 = vadd.s32 8, %v3185_v5  ;;  %v99_v9 = vsub.s32 1, %v3185_v5  ;;  %v107_v10 = vsub.s32 3, %v3185_v5  ;;  %v3201_v12 = vsub.s32 0, %v3185_v5 }
  0x5b   :  { %v3204_v13 = vsub.s32 2, %v3185_v5 }
  0x5c   :  { %v3213_v16 = vrot.slane %v3176_v1, %v99_v9  ;;  %v3216_v17 = vstv %s3174_s3  ;;  %v3219_v18 = vrot.slane %v3178_v2, %v99_v9  ;;  %v3222_v19 = vrot.slane %v3187_v6, %v99_v9  ;;  %s135_s9 = smul.f32 %s3174_s3, %s3174_s3 }
  0x5d   :  { %v3225_v20 = vstv %s3180_s7  ;;  %v3228_v21 = vrot.slane %v3191_v7, %v99_v9  ;;  %v3231_v22 = vrot.slane %v3176_v1, %v107_v10  ;;  %v3234_v23 = vrot.slane %v3178_v2, %v107_v10  ;;  %s213_s0 = smul.f32 %s3180_s7, %s3180_s7 }
  0x5e   :  { %vm110_vm1 = vcmp.eq.s32.totalorder %v3185_v5, %v3213_v16  ;;  %vm114_vm2 = vcmp.eq.s32.totalorder %v3196_v8, %v3213_v16  ;;  %vm188_vm3 = vcmp.eq.s32.totalorder %v3185_v5, %v3219_v18  ;;  %vm192_vm4 = vcmp.eq.s32.totalorder %v3196_v8, %v3219_v18  ;;  %s291_s10 = smul.f32 %s3189_s4, %s3189_s4 }
  0x5f   :  { %v120_v24 = vsel %vm110_vm1, %v3216_v17, 0.0  ;;  %v124_v25 = vsel %vm114_vm2, %v3216_v17, 0.0  ;;  %v198_v26 = vsel %vm188_vm3, %v3225_v20, 0.0  ;;  %v202_v27 = vsel %vm192_vm4, %v3225_v20, 0.0  ;;  %s369_s11 = smul.f32 %s3193_s8, %s3193_s8 }
  0x60   :  { %v206_v28 = vadd.f32 %v198_v26, %v120_v24  ;;  %v210_v29 = vadd.f32 %v202_v27, %v124_v25  ;;  %vm266_vm5 = vcmp.eq.s32.totalorder %v3185_v5, %v3222_v19  ;;  %vm4113_vm6 = vcmp.eq.s32.totalorder %v3196_v8, %v3222_v19 }
  0x61   :  { %v3265_v30 = vstv %s3189_s4  ;;  %vm4112_vm7 = vcmp.eq.s32.totalorder %v3185_v5, %v3228_v21  ;;  %vm4111_vm8 = vcmp.eq.s32.totalorder %v3196_v8, %v3228_v21  ;;  %v3272_v31 = vstv %s3193_s8 }
  0x62   :  { %v276_v32 = vsel %vm266_vm5, %v3265_v30, 0.0  ;;  %v280_v33 = vsel %vm4113_vm6, %v3265_v30, 0.0  ;;  %v354_v34 = vsel %vm4112_vm7, %v3272_v31, 0.0  ;;  %v358_v35 = vsel %vm4111_vm8, %v3272_v31, 0.0 }
  0x63   :  { %v284_v36 = vadd.f32 %v276_v32, %v206_v28  ;;  %v288_v37 = vadd.f32 %v280_v33, %v210_v29  ;;  %vm112_vm9 = vcmp.eq.s32.totalorder %v3185_v5, %v3231_v22  ;;  %vm116_vm10 = vcmp.eq.s32.totalorder %v3196_v8, %v3231_v22 }
  0x64   :  { %v122_v38 = vsel %vm112_vm9, %v3216_v17, 0.0  ;;  %v126_v39 = vsel %vm116_vm10, %v3216_v17, 0.0  ;;  %vm190_vm11 = vcmp.eq.s32.totalorder %v3185_v5, %v3234_v23  ;;  %vm4094_vm12 = vcmp.eq.s32.totalorder %v3196_v8, %v3234_v23 }
  0x65   :  { %v362_v40 = vadd.f32 %v354_v34, %v284_v36  ;;  %v366_v41 = vadd.f32 %v358_v35, %v288_v37  ;;  %v200_v42 = vsel %vm190_vm11, %v3225_v20, 0.0  ;;  %v204_v43 = vsel %vm4094_vm12, %v3225_v20, 0.0 }
  0x66   :  { %v208_v44 = vadd.f32 %v200_v42, %v122_v38  ;;  %v212_v45 = vadd.f32 %v204_v43, %v126_v39  ;;  %v3315_v46 = vrot.slane %v3187_v6, %v107_v10  ;;  %v3318_v47 = vrot.slane %v3191_v7, %v107_v10 }
  0x67   :  { %v412_v48 = vand.u32 4294901760, %v362_v40  ;;  %v416_v49 = vand.u32 4294901760, %v366_v41  ;;  %v3322_v50 = vrot.slane %v3176_v1, %v3201_v12  ;;  %v3326_v51 = vrot.slane %v3178_v2, %v3201_v12 }
  0x68   :  { %vm4092_vm13 = vcmp.eq.s32.totalorder %v3185_v5, %v3315_v46  ;;  %vm4093_vm14 = vcmp.eq.s32.totalorder %v3196_v8, %v3315_v46  ;;  %vm4115_vm15 = vcmp.eq.s32.totalorder %v3185_v5, %v3318_v47  ;;  %vm4095_vm0 = vcmp.eq.s32.totalorder %v3196_v8, %v3318_v47 }
  0x69   :  { %v3336_v52 = vpack.c.bf16 %v416_v49, %v412_v48  ;;  %v3338_v53 = vsub.f32 %v362_v40, %v412_v48  ;;  %v3340_v54 = vsub.f32 %v366_v41, %v416_v49  ;;  %v278_v55 = vsel %vm4092_vm13, %v3265_v30, 0.0 }
  0x6a   :  { %v282_v56 = vsel %vm4093_vm14, %v3265_v30, 0.0  ;;  %v286_v57 = vadd.f32 %v278_v55, %v208_v44  ;;  %v356_v58 = vsel %vm4115_vm15, %v3272_v31, 0.0  ;;  %v360_v59 = vsel %vm4095_vm0, %v3272_v31, 0.0 }
  0x6b   :  { %2742 = vmatprep.subr.bf16.mxu0 %v3336_v52  ;;  %v290_v60 = vadd.f32 %v282_v56, %v212_v45  ;;  %vm4099_vm13 = vcmp.eq.s32.totalorder %v3185_v5, %v3322_v50  ;;  %vm4097_vm14 = vcmp.eq.s32.totalorder %v3196_v8, %v3322_v50  ;;  %vm4096_vm12 = vcmp.eq.s32.totalorder %v3185_v5, %v3326_v51 }
  0x6c   :  { %v364_v61 = vadd.f32 %v356_v58, %v286_v57  ;;  %v119_v62 = vsel %vm4099_vm13, %v3216_v17, 0.0  ;;  %v123_v63 = vsel %vm4097_vm14, %v3216_v17, 0.0  ;;  %vm4098_vm0 = vcmp.eq.s32.totalorder %v3196_v8, %v3326_v51 }
  0x6d   :  { %v368_v4 = vadd.f32 %v360_v59, %v290_v60  ;;  %v197_v9 = vsel %vm4096_vm12, %v3225_v20, 0.0  ;;  %v201_v10 = vsel %vm4098_vm0, %v3225_v20, 0.0  ;;  %v3385_v11 = vrot.slane %v3187_v6, %v3201_v12 }
  0x6e   :  { %v952_v24 = vand.u32 4294901760, %v364_v61  ;;  %v205_v25 = vadd.f32 %v197_v9, %v119_v62  ;;  %v209_v26 = vadd.f32 %v201_v10, %v123_v63  ;;  %v3389_v27 = vrot.slane %v3191_v7, %v3201_v12 }
  0x6f   :  { %v956_v28 = vand.u32 4294901760, %v368_v4  ;;  %vm4101_vm12 = vcmp.eq.s32.totalorder %v3185_v5, %v3385_v11  ;;  %vm4100_vm14 = vcmp.eq.s32.totalorder %v3196_v8, %v3385_v11  ;;  %v3397_v29 = vrot.slane %v3176_v1, %v3204_v13 }
  0x70   :  { %v3399_v32 = vsub.f32 %v364_v61, %v952_v24  ;;  %v275_v33 = vsel %vm4101_vm12, %v3265_v30, 0.0  ;;  %v279_v12 = vsel %vm4100_vm14, %v3265_v30, 0.0  ;;  %vm4105_vm0 = vcmp.eq.s32.totalorder %v3185_v5, %v3389_v27 }
  0x71   :  { %v3411_v34 = vpack.c.bf16 %v956_v28, %v952_v24  ;;  %v3413_v35 = vsub.f32 %v368_v4, %v956_v28  ;;  %v283_v1 = vadd.f32 %v275_v33, %v205_v25  ;;  %v287_v36 = vadd.f32 %v279_v12, %v209_v26 }
  0x72   :  { %vm4104_vm13 = vcmp.eq.s32.totalorder %v3196_v8, %v3389_v27  ;;  %v353_v37 = vsel %vm4105_vm0, %v3272_v31, 0.0  ;;  %vm4103_vm14 = vcmp.eq.s32.totalorder %v3185_v5, %v3397_v29  ;;  %vm4102_vm12 = vcmp.eq.s32.totalorder %v3196_v8, %v3397_v29 }
  0x73   :  { %2766 = vmatprep.subr.bf16.mxu1 %v3411_v34  ;;  %v357_v38 = vsel %vm4104_vm13, %v3272_v31, 0.0  ;;  %v361_v39 = vadd.f32 %v353_v37, %v283_v1  ;;  %v121_v40 = vsel %vm4103_vm14, %v3216_v17, 0.0  ;;  %v125_v41 = vsel %vm4102_vm12, %v3216_v17, 0.0 }
  0x74   :  { %v365_v42 = vadd.f32 %v357_v38, %v287_v36  ;;  %v3440_v43 = vrot.slane %v3178_v2, %v3204_v13  ;;  %v3444_v44 = vrot.slane %v3187_v6, %v3204_v13  ;;  %v3448_v45 = vrot.slane %v3191_v7, %v3204_v13 }
  0x75   :  { %v414_v48 = vand.u32 4294901760, %v361_v39  ;;  %v3451_v49 = vand.u32 4294901760, %v3207_v14  ;;  %v3454_v55 = vand.u32 4294901760, %v3210_v15  ;;  %v505_v17 = vand.u32 4294901760, %v3338_v53 }
  0x76   :  { %v418_v56 = vand.u32 4294901760, %v365_v42  ;;  %vm4107_vm12 = vcmp.eq.s32.totalorder %v3185_v5, %v3440_v43  ;;  %vm4106_vm14 = vcmp.eq.s32.totalorder %v3196_v8, %v3440_v43  ;;  %vm267_vm13 = vcmp.eq.s32.totalorder %v3185_v5, %v3444_v44 }
  0x77   :  { %v3463_v2 = vsub.f32 %v361_v39, %v414_v48  ;;  %v199_v6 = vsel %vm4107_vm12, %v3225_v20, 0.0  ;;  %v203_v7 = vsel %vm4106_vm14, %v3225_v20, 0.0  ;;  %vm271_vm0 = vcmp.eq.s32.totalorder %v3196_v8, %v3444_v44 }
  0x78   :  { %v3475_v13 = vpack.c.bf16 %v418_v56, %v414_v48  ;;  %v3477_v57 = vsub.f32 %v365_v42, %v418_v56  ;;  %v207_v58 = vadd.f32 %v199_v6, %v121_v40  ;;  %v211_v59 = vadd.f32 %v203_v7, %v125_v41 }
  0x79   :  { %v277_v60 = vsel %vm267_vm13, %v3265_v30, 0.0  ;;  %v281_v61 = vsel %vm271_vm0, %v3265_v30, 0.0  ;;  %vm345_vm14 = vcmp.eq.s32.totalorder %v3185_v5, %v3448_v45  ;;  %vm349_vm12 = vcmp.eq.s32.totalorder %v3196_v8, %v3448_v45 }
  0x7a   :  { %2744 = vmatpush1.bf16.msra.mxu0 %v3475_v13  ;;  %v285_v20 = vadd.f32 %v277_v60, %v207_v58  ;;  %v289_v62 = vadd.f32 %v281_v61, %v211_v59  ;;  %v355_v63 = vsel %vm345_vm14, %v3272_v31, 0.0  ;;  %v359_v30 = vsel %vm349_vm12, %v3272_v31, 0.0 }
  0x7b   :  { %v3502_v4 = vsub.f32 %v3207_v14, %v3451_v49  ;;  %v3506_v9 = vsub.f32 %v3210_v15, %v3454_v55  ;;  %v506_v10 = vsub.f32 %v3338_v53, %v505_v17  ;;  %v517_v24 = vand.u32 4294901760, %v3340_v54 }
  0x7c   :  { %v363_v25 = vadd.f32 %v355_v63, %v285_v20  ;;  %v367_v26 = vadd.f32 %v359_v30, %v289_v62  ;;  %v1045_v28 = vand.u32 4294901760, %v3399_v32  ;;  %v1057_v31 = vand.u32 4294901760, %v3413_v35 }
  0x7d   :  { %v3515_v14 = vand.u32 4294901760, %v3502_v4  ;;  %v3518_v33 = vand.u32 4294901760, %v3506_v9  ;;  %v507_v15 = vand.u32 4294901760, %v506_v10  ;;  %v518_v12 = vsub.f32 %v3340_v54, %v517_v24 }
  0x7e   :  { %v954_v1 = vand.u32 4294901760, %v363_v25  ;;  %v958_v36 = vand.u32 4294901760, %v367_v26  ;;  %v1046_v37 = vsub.f32 %v3399_v32, %v1045_v28  ;;  %v1058_v38 = vsub.f32 %v3413_v35, %v1057_v31 }
  0x7f   :  { %v484_v39 = vsub.f32 %v3502_v4, %v3515_v14  ;;  %v495_v40 = vsub.f32 %v3506_v9, %v3518_v33  ;;  %v519_v41 = vand.u32 4294901760, %v518_v12  ;;  %v511_v42 = vand.u32 4294901760, %v3463_v2 }
  0x80   :  { %v3536_v48 = vpack.c.bf16 %v958_v36, %v954_v1  ;;  %v3538_v56 = vsub.f32 %v363_v25, %v954_v1  ;;  %v3540_v6 = vsub.f32 %v367_v26, %v958_v36  ;;  %v1047_v7 = vand.u32 4294901760, %v1046_v37 }
  0x81   :  { %v485_v58 = vand.u32 4294901760, %v484_v39  ;;  %v2745_v59 = vpack.c.bf16 %v519_v41, %v507_v15  ;;  %v1059_v60 = vand.u32 4294901760, %v1058_v38  ;;  %v512_v61 = vsub.f32 %v3463_v2, %v511_v42 }
  0x82   :  { %2768 = vmatpush1.bf16.msra.mxu1 %v3536_v48  ;;  %v4114_v20 = vand.u32 4294901760, %v3477_v57  ;;  %v4110_v62 = vand.u32 4294901760, %v3538_v56  ;;  %v4109_v63 = vand.u32 4294901760, %v3540_v6  ;;  %v496_v30 = vand.u32 4294901760, %v495_v40 }
  0x83   :  { %486 = vmatmul.mubr.f32.vlgmr.msra.gmra.mrb[0].mxu0 %v485_v58  ;;  %2746 = vmatprep.subr.bf16.mxu0 %v2745_v59  ;;  %v2769_v10 = vpack.c.bf16 %v1059_v60, %v1047_v7  ;;  %v3549_v25 = vstv %s135_s9  ;;  %v513_v26 = vand.u32 4294901760, %v512_v61  ;;  %v2749_v36 = vpack.c.bf16 %v3340_v54, %v3338_v53 }
  0x84   :  { %491 = vmatprep.mubr.f32.mxu0 %v3066_v3  ;;  %v524_v15 = vsub.f32 %v3477_v57, %v4114_v20  ;;  %v1052_v12 = vsub.f32 %v3538_v56, %v4110_v62  ;;  %v1064_v1 = vsub.f32 %v3540_v6, %v4109_v63  ;;  %v2773_v37 = vpack.c.bf16 %v3413_v35, %v3399_v32 }
  0x85   :  { %1026 = vmatmul.mubr.f32.vlgmr.msra.gmra.mrb[0].mxu1 %v485_v58  ;;  %2770 = vmatprep.subr.bf16.mxu1 %v2769_v10  ;;  %v138_v41 = vsel %vm110_vm1, %v3549_v25, 0.0  ;;  %v2751_v7 = vpack.c.bf16 %v3477_v57, %v3463_v2  ;;  %v2775_v58 = vpack.c.bf16 %v3540_v6, %v3538_v56  ;;  %v142_v59 = vsel %vm114_vm2, %v3549_v25, 0.0 }
  0x86   :  { %1031 = vmatprep.mubr.f32.mxu1 %v3066_v3  ;;  %v525_v38 = vand.u32 4294901760, %v524_v15  ;;  %v1053_v39 = vand.u32 4294901760, %v1052_v12  ;;  %v1065_v40 = vand.u32 4294901760, %v1064_v1  ;;  %v3584_v60 = vstv %s213_s0 }
  0x87   :  { %497 = vmatmul.mubr.f32.gmra.mrb[2].mxu0 %v496_v30  ;;  %v216_v15 = vsel %vm188_vm3, %v3584_v60, 0.0  ;;  %v220_v12 = vsel %vm192_vm4, %v3584_v60, 0.0  ;;  %v3595_v63 = vstv %s291_s10  ;;  %v3597_v62 = vstv %s369_s11 }
  0x88   :  { %v2747_v61 = vpack.c.bf16 %v525_v38, %v513_v26  ;;  %v2771_v10 = vpack.c.bf16 %v1065_v40, %v1053_v39  ;;  %587 = vmatprep.mubr.f32.mxu0 %v3066_v3  ;;  %v224_v1 = vadd.f32 %v216_v15, %v138_v41  ;;  %v228_v0 = vadd.f32 %v220_v12, %v142_v59 }
  0x89   :  { %1037 = vmatmul.mubr.f32.gmra.mrb[2].mxu1 %v496_v30  ;;  %v294_v26 = vsel %vm266_vm5, %v3595_v63, 0.0  ;;  %v298_v38 = vsel %vm4113_vm6, %v3595_v63, 0.0  ;;  %v372_v30 = vsel %vm4112_vm7, %v3597_v62, 0.0  ;;  %v376_v39 = vsel %vm4111_vm8, %v3597_v62, 0.0 }
  0x8a   :  { %2748 = vmatpush1.bf16.msra.mxu0 %v2747_v61  ;;  %2772 = vmatpush1.bf16.msra.mxu1 %v2771_v10  ;;  %v302_v40 = vadd.f32 %v294_v26, %v224_v1  ;;  %v306_v41 = vadd.f32 %v298_v38, %v228_v0  ;;  %v140_v59 = vsel %vm112_vm9, %v3549_v25, 0.0  ;;  %v144_v61 = vsel %vm116_vm10, %v3549_v25, 0.0 }
  0x8b   :  { %1127 = vmatprep.mubr.f32.mxu1 %v3066_v3  ;;  %2750 = vmatprep.subr.bf16.mxu0 %v2749_v36  ;;  %v218_v10 = vsel %vm190_vm11, %v3584_v60, 0.0  ;;  %vm4116_vm8 = vcmp.eq.s32.totalorder %v3196_v8, %v3234_v23  ;;  %vm4117_vm7 = vcmp.eq.s32.totalorder %v3185_v5, %v3315_v46  ;;  %vm4118_vm6 = vcmp.eq.s32.totalorder %v3196_v8, %v3315_v46 }
  0x8c   :  { %2774 = vmatprep.subr.bf16.mxu1 %v2773_v37  ;;  %v222_v0 = vsel %vm4116_vm8, %v3584_v60, 0.0  ;;  %v296_v36 = vsel %vm4117_vm7, %v3595_v63, 0.0  ;;  %v300_v37 = vsel %vm4118_vm6, %v3595_v63, 0.0  ;;  %v380_v15 = vadd.f32 %v372_v30, %v302_v40 }
  0x8d   :  { %589 = vmatmul.mubr.f32.vlgmr.msra.gmra.mrb[0].mxu0 %v3451_v49  ;;  %1129 = vmatmul.mubr.f32.vlgmr.msra.gmra.mrb[0].mxu1 %v3451_v49  ;;  %v384_v12 = vadd.f32 %v376_v39, %v306_v41  ;;  %v226_v1 = vadd.f32 %v218_v10, %v140_v59  ;;  %v374_v26 = vsel %vm4115_vm15, %v3597_v62, 0.0  ;;  %v230_v38 = vadd.f32 %v222_v0, %v144_v61 }
  0x8e   :  { %594 = vmatprep.mubr.f32.mxu0 %v3066_v3  ;;  %1134 = vmatprep.mubr.f32.mxu1 %v3066_v3  ;;  %vm4119_vm6 = vcmp.eq.s32.totalorder %v3196_v8, %v3318_v47  ;;  %vm4120_vm7 = vcmp.eq.s32.totalorder %v3185_v5, %v3322_v50  ;;  %vm4121_vm8 = vcmp.eq.s32.totalorder %v3196_v8, %v3322_v50  ;;  %v1500_v40 = vand.u32 4294901760, %v380_v15 }
  0x8f   :  { %v378_v20 = vsel %vm4119_vm6, %v3597_v62, 0.0  ;;  %v137_v30 = vsel %vm4120_vm7, %v3549_v25, 0.0  ;;  %v141_v39 = vsel %vm4121_vm8, %v3549_v25, 0.0  ;;  %2752 = vmatpush1.bf16.msra.mxu0 %v2751_v7  ;;  %2776 = vmatpush1.bf16.msra.mxu1 %v2775_v58  ;;  %v1504_v41 = vand.u32 4294901760, %v384_v12 }
  0x90   :  { %v304_v59 = vadd.f32 %v296_v36, %v226_v1  ;;  %vm4122_vm15 = vcmp.eq.s32.totalorder %v3185_v5, %v3326_v51  ;;  %2754 = vmatprep.subr.bf16.mxu0 %v3336_v52  ;;  %2778 = vmatprep.subr.bf16.mxu1 %v3411_v34  ;;  %v308_v10 = vadd.f32 %v300_v37, %v230_v38  ;;  %v310_v22 = vsel %vm266_vm5, 1.0, %v3066_v3 }
  0x91   :  { %v215_v61 = vsel %vm4122_vm15, %v3584_v60, 0.0  ;;  %vm4123_vm6 = vcmp.eq.s32.totalorder %v3196_v8, %v3326_v51  ;;  %vm4124_vm7 = vcmp.eq.s32.totalorder %v3185_v5, %v3385_v11  ;;  %596 = vmatmul.mubr.f32.gmra.mrb[2].mxu0 %v3454_v55  ;;  %1136 = vmatmul.mubr.f32.gmra.mrb[2].mxu1 %v3454_v55  ;;  %v2757_v36 = vpack.c.bf16 %v517_v24, %v505_v17 }
  0x92   :  { %v219_v0 = vsel %vm4123_vm6, %v3584_v60, 0.0  ;;  %v223_v7 = vadd.f32 %v215_v61, %v137_v30  ;;  %v293_v58 = vsel %vm4124_vm7, %v3595_v63, 0.0  ;;  %v2781_v37 = vpack.c.bf16 %v1057_v31, %v1045_v28  ;;  %674 = vmatprep.mubr.f32.mxu0 %v3066_v3  ;;  %1214 = vmatprep.mubr.f32.mxu1 %v3066_v3 }
  0x93   :  { %v3684_v1 = vpack.c.bf16 %v1504_v41, %v1500_v40  ;;  %vm4125_vm15 = vcmp.eq.s32.totalorder %v3196_v8, %v3385_v11  ;;  %v382_v53 = vadd.f32 %v374_v26, %v304_v59  ;;  %v386_v30 = vadd.f32 %v378_v20, %v308_v10 }
  0x94   :  { %v297_v38 = vsel %vm4125_vm15, %v3595_v63, 0.0  ;;  %v227_v54 = vadd.f32 %v219_v0, %v141_v39  ;;  %vm4126_vm8 = vcmp.eq.s32.totalorder %v3185_v5, %v3389_v27  ;;  %v301_v35 = vadd.f32 %v293_v58, %v223_v7  ;;  %v1492_v0 = vld [vmem:[#allocation9] sm:$0xff] }
  0x95   :  { %v371_v32 = vsel %vm4126_vm8, %v3597_v62, 0.0  ;;  %vm4127_vm6 = vcmp.eq.s32.totalorder %v3196_v8, %v3389_v27  ;;  %vm4128_vm7 = vcmp.eq.s32.totalorder %v3185_v5, %v3397_v29  ;;  %vm4129_vm15 = vcmp.eq.s32.totalorder %v3196_v8, %v3397_v29  ;;  %677 = vmatmul.mubr.f32.vlgmr.msra.gmra.mrb[0].mxu0 %v3502_v4  ;;  %1217 = vmatmul.mubr.f32.vlgmr.msra.gmra.mrb[0].mxu1 %v3502_v4 }
  0x96   :  { %v375_v17 = vsel %vm4127_vm6, %v3597_v62, 0.0  ;;  %v139_v24 = vsel %vm4128_vm7, %v3549_v25, 0.0  ;;  %v143_v28 = vsel %vm4129_vm15, %v3549_v25, 0.0  ;;  %v2040_v31 = vand.u32 4294901760, %v382_v53  ;;  %682 = vmatprep.mubr.f32.mxu0 %v3066_v3  ;;  %1222 = vmatprep.mubr.f32.mxu1 %v3066_v3 }
  0x97   :  { %v2044_v20 = vand.u32 4294901760, %v386_v30  ;;  %v305_v26 = vadd.f32 %v297_v38, %v227_v54  ;;  %vm4130_vm8 = vcmp.eq.s32.totalorder %v3185_v5, %v3440_v43  ;;  %v379_v59 = vadd.f32 %v371_v32, %v301_v35  ;;  %2756 = vmatpush1.bf16.msra.mxu0 %v3475_v13  ;;  %2780 = vmatpush1.bf16.msra.mxu1 %v3536_v48 }
  0x98   :  { %v217_v39 = vsel %vm4130_vm8, %v3584_v60, 0.0  ;;  %vm4131_vm6 = vcmp.eq.s32.totalorder %v3196_v8, %v3440_v43  ;;  %v295_v25 = vsel %vm267_vm13, %v3595_v63, 0.0  ;;  %v3724_v7 = vsub.f32 %v380_v15, %v1500_v40  ;;  %2758 = vmatprep.subr.bf16.mxu0 %v2757_v36  ;;  %2782 = vmatprep.subr.bf16.mxu1 %v2781_v37 }
  0x99   :  { %v221_v61 = vsel %vm4131_vm6, %v3584_v60, 0.0  ;;  %v225_v10 = vadd.f32 %v217_v39, %v139_v24  ;;  %v3726_v4 = vsub.f32 %v384_v12, %v1504_v41  ;;  %v3728_v58 = vpack.c.bf16 %v2044_v20, %v2040_v31  ;;  %685 = vmatmul.mubr.f32.gmra.mrb[2].mxu0 %v3506_v9  ;;  %1225 = vmatmul.mubr.f32.gmra.mrb[2].mxu1 %v3506_v9 }
  0x9a   :  { %v299_v60 = vsel %vm271_vm0, %v3595_v63, 0.0  ;;  %v383_v38 = vadd.f32 %v375_v17, %v305_v26  ;;  %v1502_v54 = vand.u32 4294901760, %v379_v59  ;;  %v229_v32 = vadd.f32 %v221_v61, %v143_v28  ;;  %759 = vmatprep.mubr.f32.mxu0 %v3066_v3  ;;  %1299 = vmatprep.mubr.f32.mxu1 %v3066_v3 }
  0x9b   :  { %v303_v35 = vadd.f32 %v295_v25, %v225_v10  ;;  %v3736_v15 = vsub.f32 %v382_v53, %v2040_v31  ;;  %v373_v12 = vsel %vm345_vm14, %v3597_v62, 0.0  ;;  %v377_v63 = vsel %vm349_vm12, %v3597_v62, 0.0  ;;  %v1493_v10 = vld [vmem:[#allocation9 + $0x8] sm:$0xff] }
  0x9c   :  { %vm4132_vm7 = vcmask 130048   ;;  %v3749_v41 = vsub.f32 %v386_v30, %v2044_v20  ;;  %v1506_v36 = vand.u32 4294901760, %v383_v38  ;;  %v307_v37 = vadd.f32 %v299_v60, %v229_v32 }
  0x9d   :  { %v1495_v40 = vsel %vm4132_vm7, %v1492_v0, 0  ;;  %v381_v53 = vadd.f32 %v373_v12, %v303_v35  ;;  %v4133_v17 = vand.u32 4294901760, %v3477_v57  ;;  %v4134_v24 = vand.u32 4294901760, %v3538_v56  ;;  %763 = vmatmul.mubr.f32.vlgmr.msra.gmra.mrb[0].mxu0 %v3515_v14  ;;  %1303 = vmatmul.mubr.f32.vlgmr.msra.gmra.mrb[0].mxu1 %v3515_v14  ;;  %vm4136_vm15 = vmmov %vm4132_vm7 }
  0x9e   :  { %v4135_v28 = vand.u32 4294901760, %v3540_v6  ;;  %v1593_v9 = vand.u32 4294901760, %v3724_v7  ;;  %v1605_v30 = vand.u32 4294901760, %v3726_v4  ;;  %v3763_v20 = vpack.c.bf16 %v1506_v36, %v1502_v54  ;;  %768 = vmatprep.mubr.f32.mxu0 %v3066_v3  ;;  %1308 = vmatprep.mubr.f32.mxu1 %v3066_v3 }
  0x9f   :  { %v2759_v62 = vpack.c.bf16 %v4133_v17, %v511_v42  ;;  %v3765_v26 = vsub.f32 %v379_v59, %v1502_v54  ;;  %v385_v39 = vadd.f32 %v377_v63, %v307_v37  ;;  %v2042_v61 = vand.u32 4294901760, %v381_v53 }
  0xa0   :  { %v2783_v31 = vpack.c.bf16 %v4135_v28, %v4134_v24  ;;  %v3767_v2 = vsub.f32 %v383_v38, %v1506_v36  ;;  %v3769_v57 = vand.u32 4294901760, %v1495_v40  ;;  %v1594_v42 = vsub.f32 %v3724_v7, %v1593_v9 }
  0xa1   :  { %v1606_v56 = vsub.f32 %v3726_v4, %v1605_v30  ;;  %v2046_v6 = vand.u32 4294901760, %v385_v39  ;;  %v3775_v25 = vsub.f32 %v381_v53, %v2042_v61  ;;  %v2133_v59 = vand.u32 4294901760, %v3736_v15  ;;  %2760 = vmatpush1.bf16.msra.mxu0 %v2759_v62  ;;  %1312 = vmatmul.mubr.f32.gmra.mrb[2].mxu1 %v3518_v33 }
  0xa2   :  { %v2145_v0 = vand.u32 4294901760, %v3749_v41  ;;  %v1498_v60 = vsel %vm4136_vm15, %v1493_v10, 0  ;;  %v1595_v38 = vand.u32 4294901760, %v1594_v42  ;;  %2784 = vmatpush1.bf16.msra.mxu1 %v2783_v31  ;;  %v1599_v12 = vand.u32 4294901760, %v3765_v26  ;;  %2762 = vmatprep.subr.bf16.mxu0 %v3336_v52 }
  0xa3   :  { %v1607_v54 = vand.u32 4294901760, %v1606_v56  ;;  %v3782_v32 = vpack.c.bf16 %v2046_v6, %v2042_v61  ;;  %v3784_v14 = vsub.f32 %v385_v39, %v2046_v6  ;;  %v2134_v35 = vsub.f32 %v3736_v15, %v2133_v59  ;;  %2786 = vmatprep.subr.bf16.mxu1 %v3411_v34  ;;  %772 = vmatmul.mubr.f32.gmra.mrb[2].mxu0 %v3518_v33 }
  0xa4   :  { %v3791_v63 = vsub.f32 %v1495_v40, %v3769_v57  ;;  %v2146_v37 = vsub.f32 %v3749_v41, %v2145_v0  ;;  %v1600_v17 = vsub.f32 %v3765_v26, %v1599_v12  ;;  %v1611_v62 = vand.u32 4294901760, %v3767_v2  ;;  %854 = vmatprep.mubr.f32.mxu0 %v3066_v3  ;;  %1394 = vmatprep.mubr.f32.mxu1 %v3066_v3 }
  0xa5   :  { %v2793_v36 = vpack.c.bf16 %v1607_v54, %v1595_v38  ;;  %v2135_v53 = vand.u32 4294901760, %v2134_v35  ;;  %v2139_v24 = vand.u32 4294901760, %v3775_v25  ;;  %v3801_v52 = vand.u32 4294901760, %v1498_v60  ;;  %1396 = vmatmul.mubr.f32.vlgmr.msra.gmra.mrb[0].mxu1 %v3451_v49 }
  0xa6   :  { %v2147_v34 = vand.u32 4294901760, %v2146_v37  ;;  %v2151_v40 = vand.u32 4294901760, %v3784_v14  ;;  %v2797_v28 = vpack.c.bf16 %v3726_v4, %v3724_v7  ;;  %v1601_v33 = vand.u32 4294901760, %v1600_v17  ;;  %1401 = vmatprep.mubr.f32.mxu1 %v3066_v3  ;;  %2788 = vmatpush1.bf16.msra.mxu1 %v3536_v48 }
  0xa7   :  { %v1612_v31 = vsub.f32 %v3767_v2, %v1611_v62  ;;  %v2140_v39 = vsub.f32 %v3775_v25, %v2139_v24  ;;  %v2821_v61 = vpack.c.bf16 %v3749_v41, %v3736_v15  ;;  %v2799_v56 = vpack.c.bf16 %v3767_v2, %v3765_v26  ;;  %856 = vmatmul.mubr.f32.vlgmr.msra.gmra.mrb[0].mxu0 %v3451_v49 }
  0xa8   :  { %v2817_v10 = vpack.c.bf16 %v2147_v34, %v2135_v53  ;;  %v2152_v42 = vsub.f32 %v3784_v14, %v2151_v40  ;;  %v2823_v6 = vpack.c.bf16 %v3784_v14, %v3775_v25  ;;  %v3817_v38 = vpack.c.bf16 %v1605_v30, %v1593_v9  ;;  %861 = vmatprep.mubr.f32.mxu0 %v3066_v3 }
  0xa9   :  { %v1613_v7 = vand.u32 4294901760, %v1612_v31  ;;  %v2141_v4 = vand.u32 4294901760, %v2140_v39  ;;  %v3819_v54 = vpack.c.bf16 %v2145_v0, %v2133_v59  ;;  %v3823_v41 = vpack.c.bf16 %v1611_v62, %v1599_v12  ;;  %2764 = vmatpush1.bf16.msra.mxu0 %v3475_v13  ;;  %2814 = vmatprep.subr.bf16.mxu1 %v3728_v58  ;;  %v2628_v0 = vld [vmem:[#allocation10] sm:$0xff] }
  0xaa   :  { %v2153_v15 = vand.u32 4294901760, %v2152_v42  ;;  %v3825_v35 = vpack.c.bf16 %v2151_v40, %v2139_v24  ;;  %2790 = vmatprep.subr.bf16.mxu0 %v3684_v1  ;;  %1403 = vmatmul.mubr.f32.gmra.mrb[2].mxu1 %v3454_v55  ;;  %v3834_v30 = vand.u32 4294901760, %v3791_v63  ;;  %v1581_v59 = vsub.f32 %v1498_v60, %v3801_v52  ;;  %v2629_v60 = vld [vmem:[#allocation10 + $0x8] sm:$0xff] }
  0xab   :  { %v2795_v37 = vpack.c.bf16 %v1613_v7, %v1601_v33  ;;  %863 = vmatmul.mubr.f32.gmra.mrb[2].mxu0 %v3454_v55  ;;  %1477 = vmatprep.mubr.f32.mxu1 %v3066_v3  ;;  %v3067_v13 = vmov 0   ;;  %vm4137_vm8 = vcmp.eq.s32.totalorder %v3185_v5, %v3322_v50  ;;  %v154_v14 = vsel %vm110_vm1, 1.0, %v3066_v3 }
  0xac   :  { %v2819_v9 = vpack.c.bf16 %v2153_v15, %v2141_v4  ;;  %937 = vmatprep.mubr.f32.mxu0 %v3066_v3  ;;  %2928 = vset.pattern.permute.xlu0 %v3067_v13  ;;  %v1572_v48 = vsub.f32 %v3791_v63, %v3834_v30  ;;  %v1582_v12 = vand.u32 4294901760, %v1581_v59  ;;  %vm4138_vm6 = vcmp.eq.s32.totalorder %v3185_v5, %v3326_v51 }
  0xad   :  { %2632 = vperm.xlu0 %2928, %v2628_v0   ;;  %vm4139_vm7 = vcmp.eq.s32.totalorder %v3185_v5, %v3397_v29  ;;  %v156_v24 = vsel %vm112_vm9, 1.0, %v3066_v3  ;;  %vm4140_vm1 = vcmp.eq.s32.totalorder %v3185_v5, %v3440_v43  ;;  %v234_v34 = vsel %vm190_vm11, 1.0, %v3066_v3 }
  0xae   :  { %1479 = vmatmul.mubr.f32.vlgmr.msra.gmra.mrb[0].mxu1 %v3451_v49  ;;  %v1583_v53 = vsub.f32 %v1581_v59, %v1582_v12  ;;  %v155_v62 = vsel %vm4139_vm7, 1.0, %v3066_v3  ;;  %vm4142_vm15 = vcmp.eq.s32.totalorder %v3196_v8, %v3326_v51  ;;  %vm4143_vm9 = vcmp.eq.s32.totalorder %v3196_v8, %v3397_v29 }
  0xaf   :  { %939 = vmatmul.mubr.f32.vlgmr.msra.gmra.mrb[0].mxu0 %v3451_v49  ;;  %1484 = vmatprep.mubr.f32.mxu1 %v3066_v3  ;;  %v1573_v49 = vand.u32 4294901760, %v1572_v48  ;;  %v159_v39 = vsel %vm4143_vm9, 1.0, %v3066_v3  ;;  %vm4144_vm11 = vcmp.eq.s32.totalorder %v3196_v8, %v3440_v43  ;;  %v160_v51 = vsel %vm116_vm10, 1.0, %v3066_v3 }
  0xb0   :  { %944 = vmatprep.mubr.f32.mxu0 %v3066_v3  ;;  %2792 = vmatpush1.bf16.msra.mxu0 %v3763_v20  ;;  %v1584_v17 = vand.u32 4294901760, %v1583_v53  ;;  %v236_v29 = vsel %vm192_vm4, 1.0, %v3066_v3  ;;  %v242_v42 = vadd.f32 %v234_v34, %v156_v24  ;;  %v311_v18 = vsel %vm267_vm13, 1.0, %v3066_v3 }
  0xb1   :  { %2816 = vmatpush1.bf16.msra.mxu1 %v3782_v32  ;;  %2794 = vmatprep.subr.bf16.mxu0 %v2793_v36  ;;  %v232_v36 = vsel %vm188_vm3, 1.0, %v3066_v3  ;;  %vm4141_vm3 = vcmp.eq.s32.totalorder %v3196_v8, %v3322_v50  ;;  %v158_v50 = vsel %vm114_vm2, 1.0, %v3066_v3  ;;  %vm4146_vm2 = vcmp.eq.s32.totalorder %v3185_v5, %v3385_v11 }
  0xb2   :  { %2818 = vmatprep.subr.bf16.mxu1 %v2817_v10  ;;  %1486 = vmatmul.mubr.f32.gmra.mrb[2].mxu1 %v3454_v55  ;;  %v157_v40 = vsel %vm4141_vm3, 1.0, %v3066_v3  ;;  %v240_v31 = vadd.f32 %v232_v36, %v154_v14  ;;  %v309_v16 = vsel %vm4146_vm2, 1.0, %v3066_v3  ;;  %vm4147_vm4 = vcmp.eq.s32.totalorder %v3196_v8, %v3385_v11 }
  0xb3   :  { %946 = vmatmul.mubr.f32.gmra.mrb[2].mxu0 %v3454_v55  ;;  %2108 = vmatprep.mubr.f32.mxu1 %v3066_v3  ;;  %vm4148_vm10 = vcmp.eq.s32.totalorder %v3185_v5, %v3315_v46  ;;  %v244_v4 = vadd.f32 %v236_v29, %v158_v50  ;;  %vm4149_vm5 = vcmp.eq.s32.totalorder %v3196_v8, %v3222_v19 }
  0xb4   :  { %1568 = vmatprep.mubr.f32.mxu0 %v3066_v3  ;;  %2637 = vperm.xlu0 %2928, %v2629_v60   ;;  %v312_v7 = vsel %vm4148_vm10, 1.0, %v3066_v3  ;;  %vm4150_vm13 = vcmp.eq.s32.totalorder %v3196_v8, %v3315_v46  ;;  %v389_v46 = vsel %vm345_vm14, 1.0, %v3066_v3  ;;  %vm4153_vm7 = vcmp.eq.s32.totalorder %v3185_v5, %v3228_v21 }
  0xb5   :  { %v316_v11 = vsel %vm4150_vm13, 1.0, %v3066_v3  ;;  %v388_v60 = vsel %vm4153_vm7, 1.0, %v3066_v3  ;;  %vm4155_vm14 = vcmp.eq.s32.totalorder %v3196_v8, %v3228_v21  ;;  %vm4156_vm3 = vcmp.eq.s32.totalorder %v3196_v8, %v3318_v47 }
  0xb6   :  { %2114 = vmatmul.mubr.f32.vlgmr.msra.gmra.mrb[4].mxu1 %v1573_v49  ;;  %v394_v45 = vsel %vm4156_vm3, 1.0, %v3066_v3 }
  0xb7   :  { %1574 = vmatmul.mubr.f32.vlgmr.msra.gmra.mrb[4].mxu0 %v1573_v49  ;;  %2119 = vmatprep.mubr.f32.mxu1 %v3066_v3  ;;  %v392_v49 = vsel %vm4155_vm14, 1.0, %v3066_v3 }
  0xb8   :  { %1579 = vmatprep.mubr.f32.mxu0 %v3066_v3  ;;  %2796 = vmatpush1.bf16.msra.mxu0 %v2795_v37  ;;  %v318_v37 = vadd.f32 %v310_v22, %v240_v31 }
  0xb9   :  { %2820 = vmatpush1.bf16.msra.mxu1 %v2819_v9  ;;  %2798 = vmatprep.subr.bf16.mxu0 %v2797_v28  ;;  %v235_v28 = vsel %vm4142_vm15, 1.0, %v3066_v3 }
  0xba   :  { %2822 = vmatprep.subr.bf16.mxu1 %v2821_v61  ;;  %2125 = vmatmul.mubr.f32.gmra.mrb[6].mxu1 %v1584_v17  ;;  %v237_v61 = vsel %vm4144_vm11, 1.0, %v3066_v3  ;;  %v396_v36 = vadd.f32 %v388_v60, %v318_v37 }
  0xbb   :  { %1585 = vmatmul.mubr.f32.gmra.mrb[6].mxu0 %v1584_v17  ;;  %2215 = vmatprep.mubr.f32.mxu1 %v3066_v3 }
  0xbc   :  { %1675 = vmatprep.mubr.f32.mxu0 %v3066_v3 }
  0xbe   :  { %2217 = vmatmul.mubr.f32.vlgmr.msra.gmra.mrb[4].mxu1 %v3769_v57 }
  0xbf   :  { %1677 = vmatmul.mubr.f32.vlgmr.msra.gmra.mrb[4].mxu0 %v3769_v57  ;;  %2222 = vmatprep.mubr.f32.mxu1 %v3066_v3 }
  0xc0   :  { %1682 = vmatprep.mubr.f32.mxu0 %v3066_v3  ;;  %2800 = vmatpush1.bf16.msra.mxu0 %v2799_v56  ;;  %v243_v56 = vadd.f32 %v235_v28, %v157_v40 }
  0xc1   :  { %2824 = vmatpush1.bf16.msra.mxu1 %v2823_v6  ;;  %2802 = vmatprep.subr.bf16.mxu0 %v3684_v1  ;;  %v313_v6 = vsel %vm4147_vm4, 1.0, %v3066_v3 }
  0xc2   :  { %2826 = vmatprep.subr.bf16.mxu1 %v3728_v58  ;;  %2224 = vmatmul.mubr.f32.gmra.mrb[6].mxu1 %v3801_v52 }
  0xc3   :  { %1684 = vmatmul.mubr.f32.gmra.mrb[6].mxu0 %v3801_v52  ;;  %2302 = vmatprep.mubr.f32.mxu1 %v3066_v3 }
  0xc4   :  { %1762 = vmatprep.mubr.f32.mxu0 %v3066_v3 }
  0xc6   :  { %2305 = vmatmul.mubr.f32.vlgmr.msra.gmra.mrb[4].mxu1 %v3791_v63 }
  0xc7   :  { %1765 = vmatmul.mubr.f32.vlgmr.msra.gmra.mrb[4].mxu0 %v3791_v63  ;;  %2310 = vmatprep.mubr.f32.mxu1 %v3066_v3  ;;  %v231_v63 = vsel %vm4138_vm6, 1.0, %v3066_v3  ;;  %vm4152_vm6 = vcmp.eq.s32.totalorder %v3196_v8, %v3389_v27 }
  0xc8   :  { %1770 = vmatprep.mubr.f32.mxu0 %v3066_v3  ;;  %2804 = vmatpush1.bf16.msra.mxu0 %v3763_v20  ;;  %v391_v19 = vsel %vm4152_vm6, 1.0, %v3066_v3 }
  0xc9   :  { %2828 = vmatpush1.bf16.msra.mxu1 %v3782_v32  ;;  %2806 = vmatprep.subr.bf16.mxu0 %v3817_v38 }
  0xca   :  { %2830 = vmatprep.subr.bf16.mxu1 %v3819_v54  ;;  %2313 = vmatmul.mubr.f32.gmra.mrb[6].mxu1 %v1581_v59  ;;  %v315_v54 = vsel %vm271_vm0, 1.0, %v3066_v3  ;;  %vm4151_vm0 = vcmp.eq.s32.totalorder %v3185_v5, %v3389_v27 }
  0xcb   :  { %1773 = vmatmul.mubr.f32.gmra.mrb[6].mxu0 %v1581_v59  ;;  %2387 = vmatprep.mubr.f32.mxu1 %v3066_v3  ;;  %v320_v59 = vadd.f32 %v312_v7, %v242_v42  ;;  %v387_v44 = vsel %vm4151_vm0, 1.0, %v3066_v3 }
  0xcc   :  { %1847 = vmatprep.mubr.f32.mxu0 %v3066_v3 }
  0xce   :  { %2391 = vmatmul.mubr.f32.vlgmr.msra.gmra.mrb[4].mxu1 %v3834_v30 }
  0xcf   :  { %1851 = vmatmul.mubr.f32.vlgmr.msra.gmra.mrb[4].mxu0 %v3834_v30  ;;  %2396 = vmatprep.mubr.f32.mxu1 %v3066_v3  ;;  %v321_v30 = vadd.f32 %v313_v6, %v243_v56 }
  0xd0   :  { %1856 = vmatprep.mubr.f32.mxu0 %v3066_v3  ;;  %2808 = vmatpush1.bf16.msra.mxu0 %v3823_v41  ;;  %v314_v41 = vsel %vm4149_vm5, 1.0, %v3066_v3 }
  0xd1   :  { %2832 = vmatpush1.bf16.msra.mxu1 %v3825_v35  ;;  %2810 = vmatprep.subr.bf16.mxu0 %v3684_v1  ;;  %v322_v13 = vadd.f32 %v314_v41, %v244_v4  ;;  %v399_v17 = vadd.f32 %v391_v19, %v321_v30 }
  0xd2   :  { %2834 = vmatprep.subr.bf16.mxu1 %v3728_v58  ;;  %2400 = vmatmul.mubr.f32.gmra.mrb[6].mxu1 %v1582_v12 }
  0xd3   :  { %1860 = vmatmul.mubr.f32.gmra.mrb[6].mxu0 %v1582_v12  ;;  %2482 = vmatprep.mubr.f32.mxu1 %v3066_v3  ;;  %v393_v12 = vsel %vm349_vm12, 1.0, %v3066_v3  ;;  %v400_v24 = vadd.f32 %v392_v49, %v322_v13 }
  0xd4   :  { %1942 = vmatprep.mubr.f32.mxu0 %v3066_v3 }
  0xd6   :  { %2484 = vmatmul.mubr.f32.vlgmr.msra.gmra.mrb[4].mxu1 %v3769_v57 }
  0xd7   :  { %1944 = vmatmul.mubr.f32.vlgmr.msra.gmra.mrb[4].mxu0 %v3769_v57  ;;  %2489 = vmatprep.mubr.f32.mxu1 %v3066_v3 }
  0xd8   :  { %1949 = vmatprep.mubr.f32.mxu0 %v3066_v3  ;;  %2812 = vmatpush1.bf16.msra.mxu0 %v3763_v20 }
  0xd9   :  { %2836 = vmatpush1.bf16.msra.mxu1 %v3782_v32  ;;  %v153_v32 = vsel %vm4137_vm8, 1.0, %v3066_v3  ;;  %vm4145_vm8 = vcmp.eq.s32.totalorder %v3196_v8, %v3234_v23  ;;  %v245_v23 = vadd.f32 %v237_v61, %v159_v39 }
  0xda   :  { %2491 = vmatmul.mubr.f32.gmra.mrb[6].mxu1 %v3801_v52  ;;  %v239_v33 = vadd.f32 %v231_v63, %v153_v32  ;;  %v238_v43 = vsel %vm4145_vm8, 1.0, %v3066_v3 }
  0xdb   :  { %1951 = vmatmul.mubr.f32.gmra.mrb[6].mxu0 %v3801_v52  ;;  %2565 = vmatprep.mubr.f32.mxu1 %v3066_v3  ;;  %v246_v38 = vadd.f32 %v238_v43, %v160_v51  ;;  %v323_v0 = vadd.f32 %v315_v54, %v245_v23 }
  0xdc   :  { %2025 = vmatprep.mubr.f32.mxu0 %v3066_v3  ;;  %v317_v35 = vadd.f32 %v309_v16, %v239_v33 }
  0xdd   :  { %v324_v48 = vadd.f32 %v316_v11, %v246_v38  ;;  %v401_v63 = vadd.f32 %v393_v12, %v323_v0 }
  0xde   :  { %2567 = vmatmul.mubr.f32.vlgmr.msra.gmra.mrb[4].mxu1 %v3769_v57  ;;  %v395_v53 = vadd.f32 %v387_v44, %v317_v35 }
  0xdf   :  { %2027 = vmatmul.mubr.f32.vlgmr.msra.gmra.mrb[4].mxu0 %v3769_v57  ;;  %2572 = vmatprep.mubr.f32.mxu1 %v3066_v3 }
  0xe0   :  { %2032 = vmatprep.mubr.f32.mxu0 %v3066_v3 }
  0xe2   :  { %2574 = vmatmul.mubr.f32.gmra.mrb[6].mxu1 %v3801_v52 }
  0xe3   :  { %2034 = vmatmul.mubr.f32.gmra.mrb[6].mxu0 %v3801_v52  ;;  %v233_v52 = vsel %vm4140_vm1, 1.0, %v3066_v3  ;;  %vm4154_vm1 = vcmp.eq.s32.totalorder %v3185_v5, %v3318_v47 }
  0xe4   :  { %v241_v10 = vadd.f32 %v233_v52, %v155_v62  ;;  %v390_v27 = vsel %vm4154_vm1, 1.0, %v3066_v3  ;;  %v402_v52 = vadd.f32 %v394_v45, %v324_v48 }
  0xe5   :  { %v398_v62 = vadd.f32 %v390_v27, %v320_v59 }
  0xe6   :  { %v319_v9 = vadd.f32 %v311_v18, %v241_v10 }
  0xe8   :  { %v397_v32 = vadd.f32 %v389_v46, %v319_v9 }
 0x12c   :  { %v2633_v15 = vpop.permute.xlu0 %2632 }
 0x12d   :  { %v2640_v34 = vmul.f32 %v2633_v15, %v395_v53  ;;  %v2642_v28 = vmul.f32 %v2633_v15, %v397_v32  ;;  %v2641_v21 = vmul.f32 %v2633_v15, %v396_v36  ;;  %v2643_v31 = vmul.f32 %v2633_v15, %v398_v62 }
 0x133   :  { %v2638_v14 = vpop.permute.xlu0 %2637 }
 0x134   :  { %v2644_v40 = vmul.f32 %v2638_v14, %v399_v17  ;;  %v2646_v33 = vmul.f32 %v2638_v14, %v401_v63  ;;  %v2645_v39 = vmul.f32 %v2638_v14, %v400_v24  ;;  %v2647_v61 = vmul.f32 %v2638_v14, %v402_v52 }
 0x136   :  { %v2648_v50 = vadd.f32 %v2644_v40, %v2640_v34  ;;  %v2662_v8 = vadd.f32 %v2646_v33, %v2642_v28  ;;  %v2655_v3 = vadd.f32 %v2645_v39, %v2641_v21  ;;  %v2669_v47 = vadd.f32 %v2647_v61, %v2643_v31 }
 0x138   :  { %v2649_v51 = vrot.slane %v2648_v50, 4  ;;  %v2663_v29 = vrot.slane %v2662_v8, 4  ;;  %v2656_v43 = vrot.slane %v2655_v3, 4  ;;  %v2670_v10 = vrot.slane %v2669_v47, 4 }
 0x13a   :  { %v2650_v18 = vadd.f32 %v2649_v51, %v2648_v50  ;;  %v2664_v7 = vadd.f32 %v2663_v29, %v2662_v8  ;;  %v2657_v41 = vadd.f32 %v2656_v43, %v2655_v3  ;;  %v2671_v11 = vadd.f32 %v2670_v10, %v2669_v47 }
 0x13b   :  { %v2677_v29 = vstv %s4089_s5  ;;  %v3068_v43 = vmov 1966171168   ;;  %s3069_s5 = smov [#allocation13]  }
 0x13c   :  { %v2651_v9 = vrot.slane %v2650_v18, 2  ;;  %v2665_v44 = vrot.slane %v2664_v7, 2  ;;  %v2658_v48 = vrot.slane %v2657_v41, 2  ;;  %v2672_v12 = vrot.slane %v2671_v11, 2  ;;  %s2726_s15 = sshll.u32 %s3069_s5, 4  ;;  %s2727_s15 = int_to_ptr.vmem [resolvable:$true] %s2726_s15 }
 0x13d   :  { %v2693_v10 = vunpack.c.l.s4 %v3068_v43  ;;  %s3027_s16 = scalar_lea.vmem %s2727_s15, 64  ;;  %p3032_p8 = scmp.lt.s32.totalorder %s2727_s15, %s2727_s15 }
 0x13e   :  { %v2652_v49 = vadd.f32 %v2651_v9, %v2650_v18  ;;  %v2666_v53 = vadd.f32 %v2665_v44, %v2664_v7  ;;  %v2659_v32 = vadd.f32 %v2658_v48, %v2657_v41  ;;  %v2673_v14 = vadd.f32 %v2672_v12, %v2671_v11  ;;  %p3028_p7 = scmp.ne.s32.totalorder %s2727_s15, %s3027_s16  ;;  %p3033_p9 = scmp.lt.s32.totalorder %s3027_s16, %s3027_s16 }
 0x13f   :  { %v2694_v41 = vunpack.c.0.s8 %v2693_v10 }
 0x140   :  { %v2653_v52 = vrot.slane %v2652_v49, 1  ;;  %v2667_v28 = vrot.slane %v2666_v53, 1  ;;  %v2660_v31 = vrot.slane %v2659_v32, 1  ;;  %v2674_v39 = vrot.slane %v2673_v14, 1  ;;  %p3034_p10 = por %p3033_p9, %p3032_p8 }
 0x142   :  { %v2661_v18 = vadd.f32 %v2660_v31, %v2659_v32  ;;  %p3035_p11 = pnand %p3034_p10, %p3028_p7 }
 0x181   :  { %v3909_v1 = vpop.f32.mrb[0].mxu1 }
 0x182   :  { %v3907_v55 = vpop.f32.mrb[0].mxu0  ;;  %v3913_v20 = vpop.f32.mrb[1].mxu1  ;;  %v2582_v16 = vmul.f32 %v3909_v1, %v3909_v1 }
 0x183   :  { %v3911_v58 = vpop.f32.mrb[1].mxu0  ;;  %v2580_v42 = vmul.f32 %v3907_v55, %v3907_v55  ;;  %v2583_v22 = vmul.f32 %v3913_v20, %v3913_v20 }
 0x184   :  { %v2581_v56 = vmul.f32 %v3911_v58, %v3911_v58 }
 0x185   :  { %v3917_v2 = vpop.f32.mrb[2].mxu1 }
 0x186   :  { %v3915_v26 = vpop.f32.mrb[2].mxu0  ;;  %v3921_v25 = vpop.f32.mrb[3].mxu1  ;;  %v2586_v58 = vmul.f32 %v3917_v2, %v3917_v2 }
 0x187   :  { %v3919_v57 = vpop.f32.mrb[3].mxu0  ;;  %v2584_v1 = vmul.f32 %v3915_v26, %v3915_v26  ;;  %v2587_v37 = vmul.f32 %v3921_v25, %v3921_v25 }
 0x188   :  { %v2585_v20 = vmul.f32 %v3919_v57, %v3919_v57 }
 0x1b1   :  { %v2568_v6 = vpop.f32.mrb[4].mxu1 }
 0x1b2   :  { %v2028_v23 = vpop.f32.mrb[4].mxu0  ;;  %v2590_v38 = vsub.f32 %v2582_v16, %v2568_v6  ;;  %v2570_v15 = vpop.f32.mrb[5].mxu1  ;;  %v2668_v16 = vadd.f32 %v2667_v28, %v2666_v53 }
 0x1b3   :  { %v2588_v4 = vsub.f32 %v2580_v42, %v2028_v23  ;;  %v2030_v54 = vpop.f32.mrb[5].mxu0  ;;  %v2591_v35 = vsub.f32 %v2583_v22, %v2570_v15  ;;  %v2654_v42 = vadd.f32 %v2653_v52, %v2652_v49  ;;  %v2675_v23 = vadd.f32 %v2674_v39, %v2673_v14 }
 0x1b4   :  { %v2589_v55 = vsub.f32 %v2581_v56, %v2030_v54 }
 0x1b5   :  { %v2575_v59 = vpop.f32.mrb[6].mxu1  ;;  %v2681_v9 = vadd.f32 %v2677_v29, %v2675_v23 }
 0x1b6   :  { %v2035_v30 = vpop.f32.mrb[6].mxu0  ;;  %v2594_v19 = vsub.f32 %v2586_v58, %v2575_v59  ;;  %v2577_v13 = vpop.f32.mrb[7].mxu1 }
 0x1b7   :  { %v2592_v0 = vsub.f32 %v2584_v1, %v2035_v30  ;;  %v2037_v46 = vpop.f32.mrb[7].mxu0  ;;  %v2595_v60 = vsub.f32 %v2587_v37, %v2577_v13  ;;  %v2680_v1 = vadd.f32 %v2677_v29, %v2668_v16  ;;  %v2679_v37 = vadd.f32 %v2677_v29, %v2661_v18 }
 0x1b8   :  { %v2593_v26 = vsub.f32 %v2585_v20, %v2037_v46  ;;  %v2610_v2 = vadd.f32 %v2594_v19, %v2590_v38  ;;  %v2697_v19 = vsub.s32 %v2694_v41, %v3185_v5 }
 0x1b9   :  { %v2596_v27 = vadd.f32 %v2592_v0, %v2588_v4  ;;  %v2617_v57 = vadd.f32 %v2595_v60, %v2591_v35  ;;  %v2678_v35 = vadd.f32 %v2677_v29, %v2654_v42  ;;  %v4157_v60 = vlaneseq }
 0x1ba   :  { %v2603_v45 = vadd.f32 %v2593_v26, %v2589_v55  ;;  %v2611_v25 = vrot.slane %v2610_v2, 4 }
 0x1bb   :  { %v2597_v17 = vrot.slane %v2596_v27, 4  ;;  %v2618_v36 = vrot.slane %v2617_v57, 4  ;;  %vm2717_vm12 = vcmp.lt.s32.totalorder %v4157_v60, 512 }
 0x1bc   :  { %v2604_v63 = vrot.slane %v2603_v45, 4  ;;  %v2612_v24 = vadd.f32 %v2611_v25, %v2610_v2 }
 0x1bd   :  { %v2598_v62 = vadd.f32 %v2597_v17, %v2596_v27  ;;  %v2619_v40 = vadd.f32 %v2618_v36, %v2617_v57 }
 0x1be   :  { %v2605_v34 = vadd.f32 %v2604_v63, %v2603_v45  ;;  %v2613_v21 = vrot.slane %v2612_v24, 2 }
 0x1bf   :  { %v2599_v33 = vrot.slane %v2598_v62, 2  ;;  %v2620_v50 = vrot.slane %v2619_v40, 2 }
 0x1c0   :  { %v2606_v61 = vrot.slane %v2605_v34, 2  ;;  %v2614_v3 = vadd.f32 %v2613_v21, %v2612_v24 }
 0x1c1   :  { %v2600_v8 = vadd.f32 %v2599_v33, %v2598_v62  ;;  %v2621_v51 = vadd.f32 %v2620_v50, %v2619_v40 }
 0x1c2   :  { %v2607_v47 = vadd.f32 %v2606_v61, %v2605_v34  ;;  %v2615_v22 = vrot.slane %v2614_v3, 1 }
 0x1c3   :  { %v2601_v56 = vrot.slane %v2600_v8, 1  ;;  %v2622_v7 = vrot.slane %v2621_v51, 1 }
 0x1c4   :  { %v2608_v6 = vrot.slane %v2607_v47, 1  ;;  %v2616_v38 = vadd.f32 %v2615_v22, %v2614_v3 }
 0x1c5   :  { %v2602_v4 = vadd.f32 %v2601_v56, %v2600_v8  ;;  %v2623_v15 = vadd.f32 %v2622_v7, %v2621_v51 }
 0x1c6   :  { %v2609_v54 = vadd.f32 %v2608_v6, %v2607_v47  ;;  %v2626_v55 = vmul.f32 0.5, %v2616_v38 }
 0x1c7   :  { %v2624_v11 = vmul.f32 0.5, %v2602_v4  ;;  %v2627_v20 = vmul.f32 0.5, %v2623_v15 }
 0x1c8   :  { %v2625_v58 = vmul.f32 0.5, %v2609_v54  ;;  %v2684_v59 = vadd.f32 %v2680_v1, %v2626_v55 }
 0x1c9   :  { %v2682_v30 = vadd.f32 %v2678_v35, %v2624_v11  ;;  %v2685_v0 = vadd.f32 %v2681_v9, %v2627_v20 }
 0x1ca   :  { %v2683_v44 = vadd.f32 %v2679_v37, %v2625_v58 }
 0x1cb   :  { %v2691_v13 = vcombine.low %v2684_v59, %v2685_v0 }
 0x1cc   :  { %v2690_v46 = vcombine.low %v2682_v30, %v2683_v44 }
 0x1cd   :  { %v2705_v12 = vrot.slane %v2691_v13, %v2697_v19 }
 0x1ce   :  { %v2698_v48 = vrot.slane %v2690_v46, %v2697_v19 }
 0x1d0   :  { %v2706_v26 = vcombine.low %v2698_v48, %v2705_v12 }
 0x1d2   :  { %v2713_v27 = vrot.slane %v2706_v26, %v2697_v19 }
 0x1d4   :  { %2719 = vst.msk [vmem:[#allocation13] sm:$0xf] %vm2717_vm12, %v2713_v27 }
 0x1d5   :  { %3038 = shalt.err (!%p3035_p11)
}
 0x1d6   :  { %s3039_s19 = scalar_lea.hbm %s4090_s6, 64 }
 0x1d7   :  { %p3040_p12 = scmp.ne.s32.totalorder %s4090_s6, %s3039_s19  ;;  %p3043_p13 = scmp.lt.u32.totalorder %s3039_s19, %s4090_s6 }
 0x1d9   :  { %p3045_p0 = pnand %p3043_p13, %p3040_p12 }
 0x1db   :  { %3048 = shalt.err (!%p3045_p0)
}
 0x1dc   :  { %2729 = dma.vmem_to_hbm [thread:$0]  %s2727_s15, 64, %s4090_s6, [#allocation5]  }
 0x1dd   :  { %3057 = dma.done.wait [#allocation5], 64  }
 0x1de   :  { %3058 = vsyncadd [#allocation5], 4294967232 }
 0x1df   :  { %2733 = vsyncpa [#allocation4], 1 }
 0x1e0   :  { %2734 = vsyncpa [#allocation8], 1 }
 0x1e1   :  { %2735 = vsyncpa [#allocation11], 1 }
 0x1e2   :  { %2736 = vsyncpa [#allocation5], 1 }
 0x1e3   :  { %2737 = vsyncpa [#allocation6], 1 }

</bundles_post_ra>
